<compile_context>
chip_gen: v7x
topology: tpu7x:2x2x1
jax: 0.10.0
libtpu: 0.0.40
codegen_flags: <defaults>
</compile_context>

<pallas_src>
import functools

import jax
import jax.numpy as jnp
import numpy as np
from jax.experimental import pallas as pl
from jax.experimental.pallas import tpu as pltpu


# ---------------------------------------------------------------------------
# Kernels
# ---------------------------------------------------------------------------
def _ca_kernel_flat(x_ref, p_ref, w1_ref, w2_ref, w3_ref,
                    b1_ref, b2_ref, b3_ref, ew_ref, eh_ref, o_ref):
    """Lane-dense path: x tile is [Bt*C, H*W]."""
    C = w2_ref.shape[0]
    W = ew_ref.shape[0]
    Bt = x_ref.shape[0] // C

    w1 = w1_ref[...]
    w2 = w2_ref[...]
    w3 = w3_ref[...]
    b1 = b1_ref[...]
    b2 = b2_ref[...]
    b3 = b3_ref[...]

    x = x_ref[...]                                        # [Bt*C, HW], native dtype

    # Both adaptive-average pools as one MXU matmul (f32 accumulation):
    # columns [0, W) = mean over H (x_avg), columns [W, W+H) = mean over W (y_avg).
    pooled = jnp.dot(x, p_ref[...], preferred_element_type=jnp.float32)  # [Bt*C, W+H]

    aw_parts, ah_parts = [], []
    for b in range(Bt):                                   # tiny channel-mixing convs
        pb = pooled[b * C:(b + 1) * C, :]                 # [C, W+H]
        # Shared 1x1 conv (eval-mode BN folded in) + SiLU.
        s = jnp.dot(w1, pb, preferred_element_type=jnp.float32) + b1      # [Cr, W+H]
        s = s * jax.nn.sigmoid(s)
        # Gate convs only on the half each gate owns (sliced s).
        aw_parts.append(jax.nn.sigmoid(
            jnp.dot(w2, s[:, :W], preferred_element_type=jnp.float32) + b2))  # [C, W]
        ah_parts.append(jax.nn.sigmoid(
            jnp.dot(w3, s[:, W:], preferred_element_type=jnp.float32) + b3))  # [C, H]
    a_w = aw_parts[0] if Bt == 1 else jnp.concatenate(aw_parts, axis=0)   # [Bt*C, W]
    a_h = ah_parts[0] if Bt == 1 else jnp.concatenate(ah_parts, axis=0)   # [Bt*C, H]

    # Broadcast the gates back to the lane-dense [Bt*C, HW] layout with the
    # halved 0/1 expansion matmuls, staying in the input dtype.
    gw = jnp.dot(a_w.astype(x.dtype), ew_ref[...], preferred_element_type=x.dtype)
    gh = jnp.dot(a_h.astype(x.dtype), eh_ref[...], preferred_element_type=x.dtype)
    o_ref[...] = (x * gw * gh).astype(o_ref.dtype)        # unmasked lane-dense store


def _ca_kernel_block(x_ref, w1_ref, w2_ref, w3_ref,
                     b1_ref, b2_ref, b3_ref, o_ref):
    """Aligned path (W % 128 == 0): x tile is [Bt, C, H, W]; no constants."""
    Bt, C, H, W = x_ref.shape

    w1 = w1_ref[...]
    w2 = w2_ref[...]
    w3 = w3_ref[...]
    b1 = b1_ref[...]
    b2 = b2_ref[...]
    b3 = b3_ref[...]

    x = x_ref[...]                                        # [Bt, C, H, W], native dtype
    x_avg = jnp.mean(x, axis=2, dtype=jnp.float32)        # [Bt, C, W]  (mean over H)
    y_avg = jnp.mean(x, axis=3, dtype=jnp.float32)        # [Bt, C, H]  (mean over W)

    for b in range(Bt):                                   # tiny channel-mixing convs
        # 1x1 conv + BN + SiLU act per spatial position, so applying them to
        # the two pooled halves separately is identical to cat -> conv -> split.
        sw = jnp.dot(w1, x_avg[b], preferred_element_type=jnp.float32) + b1   # [Cr, W]
        sw = sw * jax.nn.sigmoid(sw)
        sh = jnp.dot(w1, y_avg[b], preferred_element_type=jnp.float32) + b1   # [Cr, H]
        sh = sh * jax.nn.sigmoid(sh)
        a_w = jax.nn.sigmoid(
            jnp.dot(w2, sw, preferred_element_type=jnp.float32) + b2)         # [C, W]
        a_h = jax.nn.sigmoid(
            jnp.dot(w3, sh, preferred_element_type=jnp.float32) + b3)         # [C, H]
        xb = x[b]                                                              # [C, H, W]
        gate = (a_h.astype(xb.dtype)[:, :, None] *
                a_w.astype(xb.dtype)[:, None, :])          # VPU broadcasts, [C, H, W]
        o_ref[b] = (xb * gate).astype(o_ref.dtype)


# ---------------------------------------------------------------------------
# Host-side helpers
# ---------------------------------------------------------------------------
@functools.lru_cache(maxsize=None)
def _pool_expand_consts(H, W, dtype_name):
    """[HW, W+H] pooling matrix and halved one-hot gate-expansion matrices."""
    HW = H * W
    lin = np.arange(HW)
    onehot_w = ((lin % W)[:, None] == np.arange(W)[None, :]).astype(np.float64)   # [HW, W]
    onehot_h = ((lin // W)[:, None] == np.arange(H)[None, :]).astype(np.float64)  # [HW, H]
    P = np.concatenate([onehot_w / H, onehot_h / W], axis=1)                      # [HW, W+H]
    return (jnp.asarray(P, dtype=dtype_name),
            jnp.asarray(onehot_w.T, dtype=dtype_name),      # Ew [W, HW]
            jnp.asarray(onehot_h.T, dtype=dtype_name))      # Eh [H, HW]


def _choose_bt(B, per_b_bytes, budget_bytes, row_mult=None, total_rows=None):
    """Largest divisor of B whose per-step footprint fits the budget (falls
    back to the smallest layout-valid divisor)."""
    fallback = B
    for bt in range(B, 0, -1):
        if B % bt:
            continue
        if row_mult is not None:
            rows = bt * row_mult
            if rows % 8 != 0 and rows != total_rows:
                continue                                    # (8,128) sublane rule
        fallback = bt
        if bt * per_b_bytes <= budget_bytes:
            return bt
    return fallback


def _full_spec(a):
    n = a.ndim
    zeros = (0,) * n
    return pl.BlockSpec(a.shape, lambda i: zeros)


_VMEM_BUDGET = 40 << 20     # per-step working-set target (fits v7x's 64 MiB VMEM)
_VMEM_CAP = 56 << 20        # leave Mosaic internal-scratch headroom


# ---------------------------------------------------------------------------
# Forward wrapper
# ---------------------------------------------------------------------------
def ca_forward(x, params):
    """Pallas CA forward.  x: [B, C, H, W] (NCHW), eval-mode BatchNorm."""
    B, C, H, W = x.shape
    # The PyTorch forward's split((W+H)//2) only broadcasts correctly when H == W.
    assert H == W, "CA.forward only broadcasts correctly when H == W"
    w1, b1, gamma, beta, mean, var, w2, b2, w3, b3 = params
    HW = H * W
    isz = x.dtype.itemsize

    # Fold eval-mode BatchNorm into the shared 1x1 conv (tiny host-side ops).
    scale = gamma / jnp.sqrt(var + 1e-5)                       # [Cr, 1]
    w1f = (w1 * scale).astype(jnp.float32)                     # [Cr, C]
    b1f = ((b1 - mean) * scale + beta).astype(jnp.float32)     # [Cr, 1]
    w2f = w2.astype(jnp.float32)
    b2f = b2.astype(jnp.float32)
    w3f = w3.astype(jnp.float32)
    b3f = b3.astype(jnp.float32)

    cdt = x.dtype if jnp.issubdtype(x.dtype, jnp.floating) else jnp.float32
    weight_bytes = 4 * (w1f.size + w2f.size + w3f.size +
                        b1f.size + b2f.size + b3f.size)

    if W % 128 == 0:
        # ---- aligned path: 4D blocks, VPU-broadcast gating, no constants ----
        per_b = C * HW * (4 * isz + 2 * isz + 8)   # dbl-buffered in+out, gate temp, pooled
        Bt = _choose_bt(B, per_b, _VMEM_BUDGET)
        est = Bt * per_b + 2 * weight_bytes + (2 << 20)
        vmem_limit = int(min(max(est, 32 << 20), _VMEM_CAP))
        return pl.pallas_call(
            _ca_kernel_block,
            out_shape=jax.ShapeDtypeStruct((B, C, H, W), x.dtype),
            grid_spec=pltpu.PrefetchScalarGridSpec(
                num_scalar_prefetch=0,
                grid=(B // Bt,),
                in_specs=[
                    pl.BlockSpec((Bt, C, H, W), lambda i: (i, 0, 0, 0)),
                    _full_spec(w1f), _full_spec(w2f), _full_spec(w3f),
                    _full_spec(b1f), _full_spec(b2f), _full_spec(b3f),
                ],
                out_specs=pl.BlockSpec((Bt, C, H, W), lambda i: (i, 0, 0, 0)),
            ),
            compiler_params=pltpu.CompilerParams(
                dimension_semantics=("parallel",),
                vmem_limit_bytes=vmem_limit),
        )(x, w1f, w2f, w3f, b1f, b2f, b3f)

    # ---- lane-dense path (small / unaligned W): flattened [B*C, HW] view ----
    P, Ew, Eh = _pool_expand_consts(H, W, np.dtype(cdt).name)
    x2 = x.reshape(B * C, HW)                              # free view of contiguous NCHW
    per_b = C * HW * (4 * isz + 3 * isz) + C * (W + H) * 4  # io + gate temps + pooled
    Bt = _choose_bt(B, per_b, _VMEM_BUDGET, row_mult=C, total_rows=B * C)
    const_bytes = ((P.size + Ew.size + Eh.size) * np.dtype(cdt).itemsize
                   + weight_bytes)
    est = Bt * per_b + 2 * const_bytes + (2 << 20)
    vmem_limit = int(min(max(est, 32 << 20), _VMEM_CAP))
    out = pl.pallas_call(
        _ca_kernel_flat,
        out_shape=jax.ShapeDtypeStruct((B * C, HW), x.dtype),
        grid_spec=pltpu.PrefetchScalarGridSpec(
            num_scalar_prefetch=0,
            grid=(B // Bt,),
            in_specs=[
                pl.BlockSpec((Bt * C, HW), lambda i: (i, 0)),
                _full_spec(P),
                _full_spec(w1f), _full_spec(w2f), _full_spec(w3f),
                _full_spec(b1f), _full_spec(b2f), _full_spec(b3f),
                _full_spec(Ew), _full_spec(Eh),
            ],
            out_specs=pl.BlockSpec((Bt * C, HW), lambda i: (i, 0)),
        ),
        compiler_params=pltpu.CompilerParams(
            dimension_semantics=("parallel",),
            vmem_limit_bytes=vmem_limit),
    )(x2, P, w1f, w2f, w3f, b1f, b2f, b3f, Ew, Eh)
    return out.reshape(B, C, H, W)


# ---------------------------------------------------------------------------
# Parameters + pure-JAX reference (mirrors the PyTorch forward, eval-mode BN)
# ---------------------------------------------------------------------------
def make_params(key, dim, ratio=1):
    cr = dim // ratio
    ks = jax.random.split(key, 8)
    w1 = 0.2 * jax.random.normal(ks[0], (cr, dim), jnp.float32)    # conv   weight
    b1 = 0.1 * jax.random.normal(ks[1], (cr, 1), jnp.float32)      # conv   bias
    gamma = 1.0 + 0.1 * jax.random.normal(ks[2], (cr, 1), jnp.float32)  # bn weight
    beta = 0.1 * jax.random.normal(ks[3], (cr, 1), jnp.float32)         # bn bias
    mean = 0.1 * jax.random.normal(ks[4], (cr, 1), jnp.float32)         # bn running_mean
    var = 1.0 + 0.05 * jnp.abs(jax.random.normal(ks[5], (cr, 1), jnp.float32))  # running_var
    w2 = 0.2 * jax.random.normal(ks[6], (dim, cr), jnp.float32)    # conv_1 weight
    b2 = jnp.zeros((dim, 1), jnp.float32)                          # conv_1 bias
    w3 = 0.2 * jax.random.normal(ks[7], (dim, cr), jnp.float32)    # conv_2 weight
    b3 = jnp.zeros((dim, 1), jnp.float32)                          # conv_2 bias
    return (w1, b1, gamma, beta, mean, var, w2, b2, w3, b3)


def ca_reference(x, params):
    w1, b1, gamma, beta, mean, var, w2, b2, w3, b3 = params
    eps = 1e-5
    x_avg = jnp.mean(x, axis=2)                          # [B, C, W]
    y_avg = jnp.mean(x, axis=3)                          # [B, C, H]
    combined = jnp.concatenate([x_avg, y_avg], axis=2)   # [B, C, W+H]
    y = jnp.einsum("oc,bcl->bol", w1, combined) + b1[None]
    y = (y - mean[None]) / jnp.sqrt(var[None] + eps) * gamma[None] + beta[None]
    y = y * jax.nn.sigmoid(y)
    W = x.shape[3]
    s1, s2 = y[:, :, :W], y[:, :, W:]
    a_w = jax.nn.sigmoid(jnp.einsum("oc,bcw->bow", w2, s1) + b2[None])  # [B, C, W]
    a_h = jax.nn.sigmoid(jnp.einsum("oc,bch->boh", w3, s2) + b3[None])  # [B, C, H]
    return x * a_h[:, :, :, None] * a_w[:, :, None, :]


if __name__ == "__main__":
    key = jax.random.PRNGKey(0)
    kx1, kx2, kp = jax.random.split(key, 3)
    params = make_params(kp, dim=8, ratio=1)

    # Path 1: small spatial extent (W < 128) -> lane-dense flattened kernel.
    x1 = jax.random.normal(kx1, (2, 8, 16, 16), jnp.float32)
    out1 = jax.block_until_ready(ca_forward(x1, params))
    ref1 = jax.block_until_ready(ca_reference(x1, params))
    assert out1.shape == x1.shape
    assert jnp.allclose(out1, ref1, atol=1e-3, rtol=1e-3)

    # Path 2: lane-aligned spatial extent (W % 128 == 0) -> 4D-block kernel.
    x2 = jax.random.normal(kx2, (2, 8, 128, 128), jnp.float32)
    out2 = jax.block_until_ready(ca_forward(x2, params))
    ref2 = jax.block_until_ready(ca_reference(x2, params))
    assert out2.shape == x2.shape
    assert jnp.allclose(out2, ref2, atol=1e-3, rtol=1e-3)

    print("KERNEL_OK")
</pallas_src>

<mosaic_0001>
module attributes {stable_mosaic.version = 11 : i64} {
  func.func @_ca_kernel_flat(%arg0: i32, %arg1: memref<16x256xf32, #tpu.memory_space<vmem>>, %arg2: memref<256x32xf32, #tpu.memory_space<vmem>>, %arg3: memref<8x8xf32, #tpu.memory_space<vmem>>, %arg4: memref<8x8xf32, #tpu.memory_space<vmem>>, %arg5: memref<8x8xf32, #tpu.memory_space<vmem>>, %arg6: memref<8x1xf32, #tpu.memory_space<vmem>>, %arg7: memref<8x1xf32, #tpu.memory_space<vmem>>, %arg8: memref<8x1xf32, #tpu.memory_space<vmem>>, %arg9: memref<16x256xf32, #tpu.memory_space<vmem>>, %arg10: memref<16x256xf32, #tpu.memory_space<vmem>>, %arg11: memref<16x256xf32, #tpu.memory_space<vmem>>) attributes {dimension_semantics = [#tpu.dimension_semantics<parallel>], iteration_bounds = array<i64: 1>, scalar_prefetch = 0 : i64, scratch_operands = 0 : i64, tpu.core_type = #tpu.core_type<tc>, window_params = [{transform_indices = @transform_0, window_bounds = array<i64: 16, 256>}, {pipeline_mode = #tpu.pipeline_mode<synchronous>, transform_indices = @transform_1, window_bounds = array<i64: 256, 32>}, {pipeline_mode = #tpu.pipeline_mode<synchronous>, transform_indices = @transform_2, window_bounds = array<i64: 8, 8>}, {pipeline_mode = #tpu.pipeline_mode<synchronous>, transform_indices = @transform_3, window_bounds = array<i64: 8, 8>}, {pipeline_mode = #tpu.pipeline_mode<synchronous>, transform_indices = @transform_4, window_bounds = array<i64: 8, 8>}, {pipeline_mode = #tpu.pipeline_mode<synchronous>, transform_indices = @transform_5, window_bounds = array<i64: 8, 1>}, {pipeline_mode = #tpu.pipeline_mode<synchronous>, transform_indices = @transform_6, window_bounds = array<i64: 8, 1>}, {pipeline_mode = #tpu.pipeline_mode<synchronous>, transform_indices = @transform_7, window_bounds = array<i64: 8, 1>}, {pipeline_mode = #tpu.pipeline_mode<synchronous>, transform_indices = @transform_8, window_bounds = array<i64: 16, 256>}, {pipeline_mode = #tpu.pipeline_mode<synchronous>, transform_indices = @transform_9, window_bounds = array<i64: 16, 256>}, {transform_indices = @transform_10, window_bounds = array<i64: 16, 256>}]} {
    %c0 = arith.constant 0 : index
    %c0_0 = arith.constant 0 : index
    %0 = vector.load %arg3[%c0, %c0_0] : memref<8x8xf32, #tpu.memory_space<vmem>>, vector<8x8xf32>
    %c0_1 = arith.constant 0 : index
    %c0_2 = arith.constant 0 : index
    %1 = vector.load %arg4[%c0_1, %c0_2] : memref<8x8xf32, #tpu.memory_space<vmem>>, vector<8x8xf32>
    %c0_3 = arith.constant 0 : index
    %c0_4 = arith.constant 0 : index
    %2 = vector.load %arg5[%c0_3, %c0_4] : memref<8x8xf32, #tpu.memory_space<vmem>>, vector<8x8xf32>
    %c0_5 = arith.constant 0 : index
    %c0_6 = arith.constant 0 : index
    %3 = vector.load %arg6[%c0_5, %c0_6] : memref<8x1xf32, #tpu.memory_space<vmem>>, vector<8x1xf32>
    %c0_7 = arith.constant 0 : index
    %c0_8 = arith.constant 0 : index
    %4 = vector.load %arg7[%c0_7, %c0_8] : memref<8x1xf32, #tpu.memory_space<vmem>>, vector<8x1xf32>
    %c0_9 = arith.constant 0 : index
    %c0_10 = arith.constant 0 : index
    %5 = vector.load %arg8[%c0_9, %c0_10] : memref<8x1xf32, #tpu.memory_space<vmem>>, vector<8x1xf32>
    %c0_11 = arith.constant 0 : index
    %c0_12 = arith.constant 0 : index
    %6 = vector.load %arg1[%c0_11, %c0_12] : memref<16x256xf32, #tpu.memory_space<vmem>>, vector<16x256xf32>
    %c0_13 = arith.constant 0 : index
    %c0_14 = arith.constant 0 : index
    %7 = vector.load %arg2[%c0_13, %c0_14] : memref<256x32xf32, #tpu.memory_space<vmem>>, vector<256x32xf32>
    %cst = arith.constant dense<0.000000e+00> : vector<16x32xf32>
    %8 = tpu.matmul %6, %7, %cst {dimension_numbers = #tpu.dot_dimension_numbers<[1], [0], [0], [1], [0, 0, 1, 1], [], []>} : vector<16x256xf32>, vector<256x32xf32>, vector<16x32xf32> -> vector<16x32xf32>
    %9 = vector.extract_strided_slice %8 {offsets = [0, 0], sizes = [8, 32], strides = [1, 1]} : vector<16x32xf32> to vector<8x32xf32>
    %cst_15 = arith.constant dense<0.000000e+00> : vector<8x32xf32>
    %10 = tpu.matmul %0, %9, %cst_15 {dimension_numbers = #tpu.dot_dimension_numbers<[1], [0], [0], [1], [0, 0, 1, 1], [], []>} : vector<8x8xf32>, vector<8x32xf32>, vector<8x32xf32> -> vector<8x32xf32>
    %11 = vector.broadcast %3 : vector<8x1xf32> to vector<8x32xf32>
    %12 = arith.addf %10, %11 : vector<8x32xf32>
    %13 = arith.negf %12 : vector<8x32xf32>
    %14 = math.exp %13 : vector<8x32xf32>
    %cst_16 = arith.constant 1.000000e+00 : f32
    %15 = vector.broadcast %cst_16 : f32 to vector<8x32xf32>
    %16 = arith.addf %15, %14 : vector<8x32xf32>
    %17 = arith.divf %15, %16 : vector<8x32xf32>
    %18 = arith.mulf %12, %17 : vector<8x32xf32>
    %19 = vector.extract_strided_slice %18 {offsets = [0, 0], sizes = [8, 16], strides = [1, 1]} : vector<8x32xf32> to vector<8x16xf32>
    %cst_17 = arith.constant dense<0.000000e+00> : vector<8x16xf32>
    %20 = tpu.matmul %1, %19, %cst_17 {dimension_numbers = #tpu.dot_dimension_numbers<[1], [0], [0], [1], [0, 0, 1, 1], [], []>} : vector<8x8xf32>, vector<8x16xf32>, vector<8x16xf32> -> vector<8x16xf32>
    %21 = vector.broadcast %4 : vector<8x1xf32> to vector<8x16xf32>
    %22 = arith.addf %20, %21 : vector<8x16xf32>
    %23 = arith.negf %22 : vector<8x16xf32>
    %24 = math.exp %23 : vector<8x16xf32>
    %cst_18 = arith.constant 1.000000e+00 : f32
    %25 = vector.broadcast %cst_18 : f32 to vector<8x16xf32>
    %26 = arith.addf %25, %24 : vector<8x16xf32>
    %27 = arith.divf %25, %26 : vector<8x16xf32>
    %28 = vector.extract_strided_slice %18 {offsets = [0, 16], sizes = [8, 16], strides = [1, 1]} : vector<8x32xf32> to vector<8x16xf32>
    %cst_19 = arith.constant dense<0.000000e+00> : vector<8x16xf32>
    %29 = tpu.matmul %2, %28, %cst_19 {dimension_numbers = #tpu.dot_dimension_numbers<[1], [0], [0], [1], [0, 0, 1, 1], [], []>} : vector<8x8xf32>, vector<8x16xf32>, vector<8x16xf32> -> vector<8x16xf32>
    %30 = vector.broadcast %5 : vector<8x1xf32> to vector<8x16xf32>
    %31 = arith.addf %29, %30 : vector<8x16xf32>
    %32 = arith.negf %31 : vector<8x16xf32>
    %33 = math.exp %32 : vector<8x16xf32>
    %cst_20 = arith.constant 1.000000e+00 : f32
    %34 = vector.broadcast %cst_20 : f32 to vector<8x16xf32>
    %35 = arith.addf %34, %33 : vector<8x16xf32>
    %36 = arith.divf %34, %35 : vector<8x16xf32>
    %37 = vector.extract_strided_slice %8 {offsets = [8, 0], sizes = [8, 32], strides = [1, 1]} : vector<16x32xf32> to vector<8x32xf32>
    %cst_21 = arith.constant dense<0.000000e+00> : vector<8x32xf32>
    %38 = tpu.matmul %0, %37, %cst_21 {dimension_numbers = #tpu.dot_dimension_numbers<[1], [0], [0], [1], [0, 0, 1, 1], [], []>} : vector<8x8xf32>, vector<8x32xf32>, vector<8x32xf32> -> vector<8x32xf32>
    %39 = vector.broadcast %3 : vector<8x1xf32> to vector<8x32xf32>
    %40 = arith.addf %38, %39 : vector<8x32xf32>
    %41 = arith.negf %40 : vector<8x32xf32>
    %42 = math.exp %41 : vector<8x32xf32>
    %cst_22 = arith.constant 1.000000e+00 : f32
    %43 = vector.broadcast %cst_22 : f32 to vector<8x32xf32>
    %44 = arith.addf %43, %42 : vector<8x32xf32>
    %45 = arith.divf %43, %44 : vector<8x32xf32>
    %46 = arith.mulf %40, %45 : vector<8x32xf32>
    %47 = vector.extract_strided_slice %46 {offsets = [0, 0], sizes = [8, 16], strides = [1, 1]} : vector<8x32xf32> to vector<8x16xf32>
    %cst_23 = arith.constant dense<0.000000e+00> : vector<8x16xf32>
    %48 = tpu.matmul %1, %47, %cst_23 {dimension_numbers = #tpu.dot_dimension_numbers<[1], [0], [0], [1], [0, 0, 1, 1], [], []>} : vector<8x8xf32>, vector<8x16xf32>, vector<8x16xf32> -> vector<8x16xf32>
    %49 = vector.broadcast %4 : vector<8x1xf32> to vector<8x16xf32>
    %50 = arith.addf %48, %49 : vector<8x16xf32>
    %51 = arith.negf %50 : vector<8x16xf32>
    %52 = math.exp %51 : vector<8x16xf32>
    %cst_24 = arith.constant 1.000000e+00 : f32
    %53 = vector.broadcast %cst_24 : f32 to vector<8x16xf32>
    %54 = arith.addf %53, %52 : vector<8x16xf32>
    %55 = arith.divf %53, %54 : vector<8x16xf32>
    %56 = vector.extract_strided_slice %46 {offsets = [0, 16], sizes = [8, 16], strides = [1, 1]} : vector<8x32xf32> to vector<8x16xf32>
    %cst_25 = arith.constant dense<0.000000e+00> : vector<8x16xf32>
    %57 = tpu.matmul %2, %56, %cst_25 {dimension_numbers = #tpu.dot_dimension_numbers<[1], [0], [0], [1], [0, 0, 1, 1], [], []>} : vector<8x8xf32>, vector<8x16xf32>, vector<8x16xf32> -> vector<8x16xf32>
    %58 = vector.broadcast %5 : vector<8x1xf32> to vector<8x16xf32>
    %59 = arith.addf %57, %58 : vector<8x16xf32>
    %60 = arith.negf %59 : vector<8x16xf32>
    %61 = math.exp %60 : vector<8x16xf32>
    %cst_26 = arith.constant 1.000000e+00 : f32
    %62 = vector.broadcast %cst_26 : f32 to vector<8x16xf32>
    %63 = arith.addf %62, %61 : vector<8x16xf32>
    %64 = arith.divf %62, %63 : vector<8x16xf32>
    %65 = tpu.concatenate %27, %55 in 0 : vector<8x16xf32>, vector<8x16xf32> -> vector<16x16xf32>
    %66 = tpu.concatenate %36, %64 in 0 : vector<8x16xf32>, vector<8x16xf32> -> vector<16x16xf32>
    %c0_27 = arith.constant 0 : index
    %c0_28 = arith.constant 0 : index
    %67 = vector.load %arg9[%c0_27, %c0_28] : memref<16x256xf32, #tpu.memory_space<vmem>>, vector<16x256xf32>
    %cst_29 = arith.constant dense<0.000000e+00> : vector<16x256xf32>
    %68 = tpu.matmul %65, %67, %cst_29 {dimension_numbers = #tpu.dot_dimension_numbers<[1], [0], [0], [1], [0, 0, 1, 1], [], []>} : vector<16x16xf32>, vector<16x256xf32>, vector<16x256xf32> -> vector<16x256xf32>
    %c0_30 = arith.constant 0 : index
    %c0_31 = arith.constant 0 : index
    %69 = vector.load %arg10[%c0_30, %c0_31] : memref<16x256xf32, #tpu.memory_space<vmem>>, vector<16x256xf32>
    %cst_32 = arith.constant dense<0.000000e+00> : vector<16x256xf32>
    %70 = tpu.matmul %66, %69, %cst_32 {dimension_numbers = #tpu.dot_dimension_numbers<[1], [0], [0], [1], [0, 0, 1, 1], [], []>} : vector<16x16xf32>, vector<16x256xf32>, vector<16x256xf32> -> vector<16x256xf32>
    %71 = arith.mulf %6, %68 : vector<16x256xf32>
    %72 = arith.mulf %71, %70 : vector<16x256xf32>
    %c0_33 = arith.constant 0 : index
    %c0_34 = arith.constant 0 : index
    %73 = vector.load %arg11[%c0_33, %c0_34] : memref<16x256xf32, #tpu.memory_space<vmem>>, vector<16x256xf32>
    tpu.vector_store %arg11[%c0_33, %c0_34], %72 {strides = array<i32>} : memref<16x256xf32, #tpu.memory_space<vmem>>, vector<16x256xf32>,
    return
  }
  func.func @transform_0(%arg0: i32) -> (i32, i32) {
    %c0_i32 = arith.constant 0 : i32
    %c0_i32_0 = arith.constant 0 : i32
    return %arg0, %c0_i32 : i32, i32
  }
  func.func @transform_1(%arg0: i32) -> (i32, i32) {
    %c0_i32 = arith.constant 0 : i32
    %c0_i32_0 = arith.constant 0 : i32
    %c0_i32_1 = arith.constant 0 : i32
    return %c0_i32, %c0_i32_0 : i32, i32
  }
  func.func @transform_2(%arg0: i32) -> (i32, i32) {
    %c0_i32 = arith.constant 0 : i32
    %c0_i32_0 = arith.constant 0 : i32
    %c0_i32_1 = arith.constant 0 : i32
    return %c0_i32, %c0_i32_0 : i32, i32
  }
  func.func @transform_3(%arg0: i32) -> (i32, i32) {
    %c0_i32 = arith.constant 0 : i32
    %c0_i32_0 = arith.constant 0 : i32
    %c0_i32_1 = arith.constant 0 : i32
    return %c0_i32, %c0_i32_0 : i32, i32
  }
  func.func @transform_4(%arg0: i32) -> (i32, i32) {
    %c0_i32 = arith.constant 0 : i32
    %c0_i32_0 = arith.constant 0 : i32
    %c0_i32_1 = arith.constant 0 : i32
    return %c0_i32, %c0_i32_0 : i32, i32
  }
  func.func @transform_5(%arg0: i32) -> (i32, i32) {
    %c0_i32 = arith.constant 0 : i32
    %c0_i32_0 = arith.constant 0 : i32
    %c0_i32_1 = arith.constant 0 : i32
    return %c0_i32, %c0_i32_0 : i32, i32
  }
  func.func @transform_6(%arg0: i32) -> (i32, i32) {
    %c0_i32 = arith.constant 0 : i32
    %c0_i32_0 = arith.constant 0 : i32
    %c0_i32_1 = arith.constant 0 : i32
    return %c0_i32, %c0_i32_0 : i32, i32
  }
  func.func @transform_7(%arg0: i32) -> (i32, i32) {
    %c0_i32 = arith.constant 0 : i32
    %c0_i32_0 = arith.constant 0 : i32
    %c0_i32_1 = arith.constant 0 : i32
    return %c0_i32, %c0_i32_0 : i32, i32
  }
  func.func @transform_8(%arg0: i32) -> (i32, i32) {
    %c0_i32 = arith.constant 0 : i32
    %c0_i32_0 = arith.constant 0 : i32
    %c0_i32_1 = arith.constant 0 : i32
    return %c0_i32, %c0_i32_0 : i32, i32
  }
  func.func @transform_9(%arg0: i32) -> (i32, i32) {
    %c0_i32 = arith.constant 0 : i32
    %c0_i32_0 = arith.constant 0 : i32
    %c0_i32_1 = arith.constant 0 : i32
    return %c0_i32, %c0_i32_0 : i32, i32
  }
  func.func @transform_10(%arg0: i32) -> (i32, i32) {
    %c0_i32 = arith.constant 0 : i32
    %c0_i32_0 = arith.constant 0 : i32
    return %arg0, %c0_i32 : i32, i32
  }
}

</mosaic_0001>

<bundles_post_ra>
// kernel: tpu_custom_call.1
= control target key start
LH: loop header
LB: loop body
LE: loop exit
PB: predicated region body
PF: predicated region fallthrough
CT: control target
= control target key end

     0   :  { %s1314_s0 = inlined_call_operand.vmem [shape: f32[16,256], index: 0, kind: input, shape index: {}]   ;;  %s1315_s1 = inlined_call_operand.vmem [shape: f32[256,32], index: 1, kind: input, shape index: {}]   ;;  %s1316_s2 = inlined_call_operand.vmem [shape: f32[8,8], index: 2, kind: input, shape index: {}]   ;;  %s1317_s3 = inlined_call_operand.vmem [shape: f32[8,8], index: 3, kind: input, shape index: {}]   ;;  %s1318_s4 = inlined_call_operand.vmem [shape: f32[8,8], index: 4, kind: input, shape index: {}]   ;;  %s1319_s5 = inlined_call_operand.vmem [shape: f32[8,1], index: 5, kind: input, shape index: {}]   ;;  %s1320_s6 = inlined_call_operand.vmem [shape: f32[8,1], index: 6, kind: input, shape index: {}]   ;;  %s1321_s7 = inlined_call_operand.vmem [shape: f32[8,1], index: 7, kind: input, shape index: {}]   ;;  %s1322_s8 = inlined_call_operand.vmem [shape: f32[16,256], index: 8, kind: input, shape index: {}]   ;;  %s1323_s9 = inlined_call_operand.vmem [shape: f32[16,256], index: 9, kind: input, shape index: {}]   ;;  %s1324_s10 = inlined_call_operand.hbm [shape: f32[16,256], index: 10, kind: output, shape index: {}]  }
   0x1   :  { %v62_v0 = vld [vmem:[%s1315_s1 + $0x80] sm:$0xff]  ;;  %v63_v1 = vld [vmem:[%s1315_s1 + $0x88] sm:$0xff]  ;;  %v64_v5 = vld [vmem:[%s1315_s1 + $0x90] sm:$0xff] }
   0x2   :  { %v46_v2 = vld [vmem:[%s1315_s1] sm:$0xff]  ;;  %v943_v3 = vpack.c.bf16 %v63_v1, %v62_v0  ;;  %v47_v4 = vld [vmem:[%s1315_s1 + $0x8] sm:$0xff]  ;;  %v65_v6 = vld [vmem:[%s1315_s1 + $0x98] sm:$0xff] }
   0x3   :  { %v945_v7 = vpack.c.bf16 %v47_v4, %v46_v2  ;;  %v947_v8 = vpack.c.bf16 %v65_v6, %v64_v5  ;;  %v48_v9 = vld [vmem:[%s1315_s1 + $0x10] sm:$0xff]  ;;  %v49_v10 = vld [vmem:[%s1315_s1 + $0x18] sm:$0xff]  ;;  %v66_v11 = vld [vmem:[%s1315_s1 + $0xa0] sm:$0xff] }
   0x4   :  { %944 = vmatprep.subr.bf16.mxu0 %v943_v3  ;;  %v67_v12 = vld [vmem:[%s1315_s1 + $0xa8] sm:$0xff]  ;;  %v949_v13 = vpack.c.bf16 %v49_v10, %v48_v9  ;;  %v50_v15 = vld [vmem:[%s1315_s1 + $0x20] sm:$0xff]  ;;  %v68_v17 = vld [vmem:[%s1315_s1 + $0xb0] sm:$0xff] }
   0x5   :  { %946 = vmatpush3.bf16.msra.mxu0 %v945_v7  ;;  %v951_v14 = vpack.c.bf16 %v67_v12, %v66_v11  ;;  %v51_v16 = vld [vmem:[%s1315_s1 + $0x28] sm:$0xff]  ;;  %v69_v18 = vld [vmem:[%s1315_s1 + $0xb8] sm:$0xff]  ;;  %v52_v21 = vld [vmem:[%s1315_s1 + $0x30] sm:$0xff] }
   0x6   :  { %948 = vmatprep.subr.bf16.mxu0 %v947_v8  ;;  %v953_v19 = vpack.c.bf16 %v51_v16, %v50_v15  ;;  %v955_v20 = vpack.c.bf16 %v69_v18, %v68_v17  ;;  %v53_v22 = vld [vmem:[%s1315_s1 + $0x38] sm:$0xff]  ;;  %v70_v23 = vld [vmem:[%s1315_s1 + $0xc0] sm:$0xff]  ;;  %v71_v24 = vld [vmem:[%s1315_s1 + $0xc8] sm:$0xff] }
   0x7   :  { %v1159_v25 = vld [vmem:[%s1314_s0 + $0x8] sm:$0xff] }
   0x8   :  { %142 = vmatprep.mubr.f32.mxu0 %v1159_v25 }
   0x9   :  { %950 = vmatpush3.bf16.msra.mxu0 %v949_v13 }
   0xa   :  { %952 = vmatprep.subr.bf16.mxu0 %v951_v14 }
   0xb   :  { %15 = vsyncpa [#allocation3], 0  ;;  %v957_v26 = vpack.c.bf16 %v53_v22, %v52_v21  ;;  %v959_v27 = vpack.c.bf16 %v71_v24, %v70_v23  ;;  %v54_v28 = vld [vmem:[%s1315_s1 + $0x40] sm:$0xff]  ;;  %v55_v29 = vld [vmem:[%s1315_s1 + $0x48] sm:$0xff]  ;;  %v1040_v50 = vmov 0.0   ;;  %vm1041_vm0 = vmmov 0  }
   0xc   :  { %v72_v30 = vld [vmem:[%s1315_s1 + $0xd0] sm:$0xff]  ;;  %v73_v31 = vld [vmem:[%s1315_s1 + $0xd8] sm:$0xff]  ;;  %v961_v32 = vpack.c.bf16 %v55_v29, %v54_v28  ;;  %v74_v36 = vld [vmem:[%s1315_s1 + $0xe0] sm:$0xff]  ;;  %913 = vmatprep.subr.mxu1 %v1040_v50  ;;  %915 = vmatprep.mubr.msk.f32.mxu1 %vm1041_vm0, %v1040_v50  ;;  %v1042_v54 = vmov 0   ;;  %vm158_vm1 = vcmask 64512   ;;  %s1043_s27 = smov 112  }
   0xd   :  { %954 = vmatpush3.bf16.msra.mxu0 %v953_v19  ;;  %v963_v33 = vpack.c.bf16 %v73_v31, %v72_v30  ;;  %v56_v34 = vld [vmem:[%s1315_s1 + $0x50] sm:$0xff]  ;;  %v57_v35 = vld [vmem:[%s1315_s1 + $0x58] sm:$0xff]  ;;  %v75_v37 = vld [vmem:[%s1315_s1 + $0xe8] sm:$0xff]  ;;  %990 = vset.pattern.permute.xlu0 %v1042_v54  ;;  %vm648_vm2 = vcmask 130048  }
   0xe   :  { %956 = vmatprep.subr.bf16.mxu0 %v955_v20  ;;  %v965_v38 = vpack.c.bf16 %v57_v35, %v56_v34  ;;  %v967_v39 = vpack.c.bf16 %v75_v37, %v74_v36  ;;  %v58_v40 = vld [vmem:[%s1315_s1 + $0x60] sm:$0xff]  ;;  %v59_v41 = vld [vmem:[%s1315_s1 + $0x68] sm:$0xff]  ;;  %v76_v42 = vld [vmem:[%s1315_s1 + $0xf0] sm:$0xff]  ;;  %991 = vset.pattern.permute.xlu1 %v1042_v54 }
   0xf   :  { %v77_v43 = vld [vmem:[%s1315_s1 + $0xf8] sm:$0xff]  ;;  %v969_v44 = vpack.c.bf16 %v59_v41, %v58_v40  ;;  %v60_v46 = vld [vmem:[%s1315_s1 + $0x70] sm:$0xff]  ;;  %v1207_v49 = vld [vmem:[%s1314_s0] sm:$0xff] }
  0x10   :  { %v971_v45 = vpack.c.bf16 %v77_v43, %v76_v42  ;;  %v61_v47 = vld [vmem:[%s1315_s1 + $0x78] sm:$0xff]  ;;  %v39_v51 = vld [vmem:[%s1319_s5] sm:$0xff]  ;;  %v1224_v53 = vld [vmem:[%s1314_s0 + $0x10] sm:$0xff] }
  0x11   :  { %958 = vmatpush3.bf16.msra.mxu0 %v957_v26  ;;  %v973_v48 = vpack.c.bf16 %v61_v47, %v60_v46  ;;  %v1219_v52 = vld [vmem:[%s1314_s0 + $0x18] sm:$0xff]  ;;  %155 = vperm.xlu0 %990, %v39_v51   ;;  %v36_v58 = vld [vmem:[%s1316_s2] sm:$0xff]  ;;  %v645_v24 = vld [vmem:[%s1322_s8 + $0x8] sm:$0xff] }
  0x12   :  { %960 = vmatprep.subr.bf16.mxu0 %v959_v27  ;;  %v37_v7 = vld [vmem:[%s1317_s3] sm:$0xff]  ;;  %v647_v26 = vld [vmem:[%s1322_s8 + $0x18] sm:$0xff]  ;;  %v646_v28 = vld [vmem:[%s1322_s8 + $0x10] sm:$0xff] }
  0x13   :  { %v41_v8 = vld [vmem:[%s1321_s7] sm:$0xff]  ;;  %v733_v29 = vld [vmem:[%s1323_s9 + $0x8] sm:$0xff]  ;;  %v735_v30 = vld [vmem:[%s1323_s9 + $0x18] sm:$0xff]  ;;  %v975_v31 = vpack.c.bf16 %v647_v26, %v645_v24 }
  0x14   :  { %v38_v9 = vld [vmem:[%s1318_s4] sm:$0xff]  ;;  %v979_v34 = vpack.c.bf16 %v735_v30, %v733_v29  ;;  %v734_v41 = vld [vmem:[%s1323_s9 + $0x10] sm:$0xff] }
  0x15   :  { %962 = vmatpush3.bf16.msra.mxu0 %v961_v32  ;;  %v40_v23 = vld [vmem:[%s1320_s6] sm:$0xff] }
  0x16   :  { %964 = vmatprep.subr.bf16.mxu0 %v963_v33  ;;  %v644_v27 = vld [vmem:[%s1322_s8] sm:$0xff] }
  0x17   :  { %v977_v32 = vpack.c.bf16 %v646_v28, %v644_v27  ;;  %v732_v40 = vld [vmem:[%s1323_s9] sm:$0xff]  ;;  %s1044_s9 = smov [#allocation2]  }
  0x18   :  { %v981_v42 = vpack.c.bf16 %v734_v41, %v732_v40  ;;  %s836_s24 = sshll.u32 %s1044_s9, 4  ;;  %s837_s24 = int_to_ptr.vmem [resolvable:$true] %s836_s24 }
  0x19   :  { %966 = vmatpush3.bf16.msra.mxu0 %v965_v38  ;;  %s1016_s25 = scalar_lea.vmem %s837_s24, 512  ;;  %p1021_p1 = scmp.lt.s32.totalorder %s837_s24, %s837_s24 }
  0x1a   :  { %968 = vmatprep.subr.bf16.mxu0 %v967_v39  ;;  %p1017_p0 = scmp.ne.s32.totalorder %s837_s24, %s1016_s25  ;;  %p1022_p2 = scmp.lt.s32.totalorder %s1016_s25, %s1016_s25 }
  0x1c   :  { %p1023_p3 = por %p1022_p2, %p1021_p1 }
  0x1d   :  { %970 = vmatpush3.bf16.msra.mxu0 %v969_v44 }
  0x1e   :  { %972 = vmatprep.subr.bf16.mxu0 %v971_v45  ;;  %p1024_p4 = pnand %p1023_p3, %p1017_p0 }
  0x21   :  { %974 = vmatpush3.bf16.msra.mxu0 %v973_v48 }
  0x24   :  { %143 = vmatmul.mubr.f32.vlgmr.msra.gmra.mrb[0].mxu0 %v1207_v49 }
  0x25   :  { %147 = vmatprep.mubr.f32.mxu0 %v1219_v52 }
  0x28   :  { %148 = vmatmul.mubr.f32.gmra.mrb[2].mxu0 %v1224_v53 }
  0x90   :  { %v156_v60 = vpop.permute.xlu0 %155 }
  0xf7   :  { %v895_v55 = vpop.f32.mrb[0].mxu0 }
  0xf8   :  { %v896_v56 = vpop.f32.mrb[1].mxu0 }
  0xf9   :  { %v897_v57 = vadd.f32 %v896_v56, %v895_v55 }
  0xfb   :  { %914 = vmatpush3.msra.mxu1 %v897_v57  ;;  %v898_v59 = vpop.f32.mrb[2].mxu0 }
  0xfc   :  { %916 = vmatmul.mubr.msk.f32.vlgmr.msra.gmra.mrb[0].mxu1 %vm158_vm1, %v36_v58  ;;  %918 = vmatprep.subr.mxu1 %v1040_v50  ;;  %v899_v3 = vpop.f32.mrb[3].mxu0 }
  0xfd   :  { %920 = vmatprep.mubr.msk.f32.mxu1 %vm1041_vm0, %v1040_v50  ;;  %v900_v4 = vadd.f32 %v899_v3, %v898_v59 }
 0x1cf   :  { %v228_v61 = vpop.f32.mrb[0].mxu1 }
 0x1d0   :  { %v229_v62 = vadd.f32 %v228_v61, %v156_v60  ;;  %v917_v63 = vpop.f32.mrb[1].mxu1 }
 0x1d2   :  { %v848_v0 = vmul.f32 -1.442695, %v229_v62 }
 0x1d4   :  { %992 = vpow2.f32 %v848_v0 }
 0x1de   :  { %v993_v1 = vpop.eup %992 }
 0x1df   :  { %v235_v2 = vadd.f32 1.0, %v993_v1 }
 0x1e1   :  { %994 = vrcp.f32 %v235_v2 }
 0x1eb   :  { %v995_v5 = vpop.eup %994 }
 0x1ec   :  { %v238_v6 = vmul.f32 %v995_v5, %v229_v62 }
 0x1ee   :  { %329 = vrot.lane.b32.xlu0 %v238_v6, %s1043_s27  ;;  %919 = vmatpush3.msra.mxu1 %v238_v6 }
 0x1ef   :  { %921 = vmatmul.mubr.msk.f32.vlgmr.msra.gmra.mrb[2].mxu1 %vm158_vm1, %v37_v7  ;;  %923 = vmatprep.subr.mxu1 %v1040_v50 }
 0x1f0   :  { %925 = vmatprep.mubr.msk.f32.mxu1 %vm1041_vm0, %v1040_v50 }
 0x1f2   :  { %325 = vperm.xlu0 %990, %v41_v8  }
 0x260   :  { %v330_v10 = vpop.permute.xlu0 %329 }
 0x261   :  { %924 = vmatpush3.msra.mxu1 %v330_v10 }
 0x262   :  { %926 = vmatmul.mubr.msk.f32.vlgmr.msra.gmra.mrb[4].mxu1 %vm158_vm1, %v38_v9  ;;  %928 = vmatprep.subr.mxu1 %v1040_v50 }
 0x263   :  { %929 = vmatpush3.msra.mxu1 %v900_v4  ;;  %930 = vmatprep.mubr.msk.f32.mxu1 %vm1041_vm0, %v1040_v50 }
 0x264   :  { %933 = vmatprep.subr.mxu1 %v1040_v50 }
 0x266   :  { %931 = vmatmul.mubr.msk.f32.vlgmr.msra.gmra.mrb[6].mxu1 %vm158_vm1, %v36_v58 }
 0x267   :  { %935 = vmatprep.mubr.msk.f32.mxu1 %vm1041_vm0, %v1040_v50 }
 0x271   :  { %v326_v44 = vpop.permute.xlu0 %325 }
 0x2c2   :  { %v313_v11 = vpop.f32.mrb[2].mxu1 }
 0x2c3   :  { %v922_v12 = vpop.f32.mrb[3].mxu1 }
 0x335   :  { %v401_v13 = vpop.f32.mrb[4].mxu1 }
 0x336   :  { %v927_v14 = vpop.f32.mrb[5].mxu1  ;;  %v402_v45 = vadd.f32 %v401_v13, %v326_v44 }
 0x338   :  { %v852_v46 = vmul.f32 -1.442695, %v402_v45 }
 0x339   :  { %v477_v15 = vpop.f32.mrb[6].mxu1 }
 0x33a   :  { %v478_v16 = vadd.f32 %v477_v15, %v156_v60  ;;  %v932_v17 = vpop.f32.mrb[7].mxu1 }
 0x33c   :  { %v854_v18 = vmul.f32 -1.442695, %v478_v16 }
 0x33e   :  { %996 = vpow2.f32 %v854_v18 }
 0x348   :  { %v997_v19 = vpop.eup %996 }
 0x349   :  { %v484_v20 = vadd.f32 1.0, %v997_v19 }
 0x34b   :  { %998 = vrcp.f32 %v484_v20 }
 0x355   :  { %v999_v21 = vpop.eup %998 }
 0x356   :  { %v487_v22 = vmul.f32 %v999_v21, %v478_v16 }
 0x358   :  { %565 = vrot.lane.b32.xlu1 %v487_v22, %s1043_s27  ;;  %934 = vmatpush3.msra.mxu1 %v487_v22 }
 0x359   :  { %936 = vmatmul.mubr.msk.f32.vlgmr.msra.gmra.mrb[8].mxu1 %vm158_vm1, %v37_v7  ;;  %938 = vmatprep.subr.mxu1 %v1040_v50 }
 0x35a   :  { %940 = vmatprep.mubr.msk.f32.mxu1 %vm1041_vm0, %v1040_v50 }
 0x35c   :  { %241 = vperm.xlu1 %991, %v40_v23  }
 0x3ca   :  { %v566_v33 = vpop.permute.xlu1 %565 }
 0x3cb   :  { %939 = vmatpush3.msra.mxu1 %v566_v33 }
 0x3cc   :  { %941 = vmatmul.mubr.msk.f32.vlgmr.msra.gmra.mrb[10].mxu1 %vm158_vm1, %v38_v9  ;;  %976 = vmatprep.subr.bf16.mxu1 %v975_v31 }
 0x3cd   :  { %978 = vmatpush1.bf16.msra.mxu1 %v977_v32  ;;  %719 = vmatprep.mubr.f32.mxu1 %v1040_v50 }
 0x3ce   :  { %980 = vmatprep.subr.bf16.mxu1 %v979_v34 }
 0x3db   :  { %v242_v35 = vpop.permute.xlu1 %241 }
 0x3dc   :  { %v314_v36 = vadd.f32 %v313_v11, %v242_v35 }
 0x3de   :  { %v850_v37 = vmul.f32 -1.442695, %v314_v36 }
 0x3e0   :  { %1000 = vpow2.f32 %v850_v37 }
 0x3ea   :  { %v1001_v38 = vpop.eup %1000 }
 0x3eb   :  { %v320_v39 = vadd.f32 1.0, %v1001_v38 }
 0x3ed   :  { %1002 = vrcp.f32 %v320_v39 }
 0x3ee   :  { %1004 = vpow2.f32 %v852_v46 }
 0x3f7   :  { %v1003_v43 = vpop.eup %1002 }
 0x3f8   :  { %859 = vmatmul.mubr.msk.f32.vlgmr.msra.gmra.mrb[12].mxu1 %vm648_vm2, %v1003_v43  ;;  %v1005_v55 = vpop.eup %1004 }
 0x3f9   :  { %725 = vmatprep.mubr.f32.mxu1 %v1040_v50  ;;  %982 = vmatpush1.bf16.msra.mxu1 %v981_v42  ;;  %v408_v58 = vadd.f32 1.0, %v1005_v55 }
 0x42c   :  { %v554_v47 = vpop.f32.mrb[8].mxu1 }
 0x42d   :  { %v555_v48 = vadd.f32 %v554_v47, %v242_v35  ;;  %v937_v51 = vpop.f32.mrb[9].mxu1 }
 0x42f   :  { %v856_v54 = vmul.f32 -1.442695, %v555_v48 }
 0x431   :  { %1006 = vpow2.f32 %v856_v54 }
 0x43b   :  { %v1007_v56 = vpop.eup %1006 }
 0x43c   :  { %v561_v57 = vadd.f32 1.0, %v1007_v56 }
 0x43e   :  { %1008 = vrcp.f32 %v561_v57 }
 0x43f   :  { %1010 = vrcp.f32 %v408_v58 }
 0x448   :  { %v1009_v59 = vpop.eup %1008 }
 0x449   :  { %860 = vmatmul.mubr.msk.f32.gmra.mrb[14].mxu1 %vm648_vm2, %v1009_v59  ;;  %v1011_v60 = vpop.eup %1010 }
 0x44a   :  { %806 = vmatprep.mubr.f32.mxu1 %v1040_v50 }
 0x44d   :  { %861 = vmatmul.mubr.msk.f32.vlgmr.msra.gmra.mrb[16].mxu1 %vm648_vm2, %v1011_v60 }
 0x44e   :  { %812 = vmatprep.mubr.f32.mxu1 %v1040_v50 }
 0x49f   :  { %v634_v61 = vpop.f32.mrb[10].mxu1 }
 0x4a0   :  { %v635_v62 = vadd.f32 %v634_v61, %v326_v44  ;;  %v942_v63 = vpop.f32.mrb[11].mxu1 }
 0x4a2   :  { %v858_v0 = vmul.f32 -1.442695, %v635_v62 }
 0x4a4   :  { %1012 = vpow2.f32 %v858_v0 }
 0x4ae   :  { %v1013_v1 = vpop.eup %1012 }
 0x4af   :  { %v641_v2 = vadd.f32 1.0, %v1013_v1 }
 0x4b1   :  { %1014 = vrcp.f32 %v641_v2 }
 0x4bb   :  { %v1015_v3 = vpop.eup %1014 }
 0x4bc   :  { %862 = vmatmul.mubr.msk.f32.gmra.mrb[18].mxu1 %vm648_vm2, %v1015_v3 }
 0x4cb   :  { %v721_v4 = vpop.f32.mrb[12].mxu1 }
 0x4cc   :  { %v723_v5 = vpop.f32.mrb[13].mxu1  ;;  %v819_v8 = vmul.f32 %v721_v4, %v1207_v49 }
 0x4cd   :  { %v820_v9 = vmul.f32 %v723_v5, %v1159_v25 }
 0x51c   :  { %v727_v6 = vpop.f32.mrb[14].mxu1 }
 0x51d   :  { %v729_v7 = vpop.f32.mrb[15].mxu1  ;;  %v821_v13 = vmul.f32 %v727_v6, %v1224_v53 }
 0x51e   :  { %v822_v14 = vmul.f32 %v729_v7, %v1219_v52 }
 0x520   :  { %v808_v50 = vpop.f32.mrb[16].mxu1 }
 0x521   :  { %v823_v10 = vmul.f32 %v819_v8, %v808_v50  ;;  %v810_v11 = vpop.f32.mrb[17].mxu1 }
 0x522   :  { %v824_v12 = vmul.f32 %v820_v9, %v810_v11 }
 0x523   :  { %827 = vst [vmem:[#allocation2] sm:$0xff] %v823_v10 }
 0x524   :  { %828 = vst [vmem:[#allocation2 + $0x8] sm:$0xff] %v824_v12 }
 0x58f   :  { %v814_v15 = vpop.f32.mrb[18].mxu1 }
 0x590   :  { %v825_v16 = vmul.f32 %v821_v13, %v814_v15  ;;  %v816_v17 = vpop.f32.mrb[19].mxu1 }
 0x591   :  { %v826_v18 = vmul.f32 %v822_v14, %v816_v17 }
 0x592   :  { %829 = vst [vmem:[#allocation2 + $0x10] sm:$0xff] %v825_v16 }
 0x593   :  { %830 = vst [vmem:[#allocation2 + $0x18] sm:$0xff] %v826_v18 }
 0x594   :  { %1027 = shalt.err (!%p1024_p4)
}
 0x595   :  { %s1028_s0 = scalar_lea.hbm %s1324_s10, 512 }
 0x596   :  { %p1029_p5 = scmp.ne.s32.totalorder %s1324_s10, %s1028_s0  ;;  %p1032_p6 = scmp.lt.u32.totalorder %s1028_s0, %s1324_s10 }
 0x598   :  { %p1034_p7 = pnand %p1032_p6, %p1029_p5 }
 0x59a   :  { %1037 = shalt.err (!%p1034_p7)
}
 0x59b   :  { %s1045_s30 = smov 256   ;;  %s1046_s11 = smov 16  }
 0x59c   :  { %842 = dma.vmem_to_hbm [thread:$0]  %s837_s24, 512, %s1324_s10, [#allocation3], %s1045_s30, %s1045_s30, %s1046_s11  }
 0x59d   :  { %1038 = dma.done.wait [#allocation3], 512  }
 0x59e   :  { %1039 = vsyncadd [#allocation3], 4294966784 }
 0x59f   :  { %846 = vsyncpa [#allocation3], 1 }

</bundles_post_ra>
